<compile_context>
chip_gen: v6e
topology: v6e:2x2x1
jax: 0.10.0
libtpu: 0.0.40
codegen_flags: <defaults>
</compile_context>

<pallas_src>
import jax
import jax.numpy as jnp
from jax.experimental import pallas as pl
from jax.experimental.pallas import tpu as pltpu

HIDDEN = 100
HIDDEN_PAD = 128          # lane-aligned hidden width (zero padding is inert)
OUT_DIM = 28 * 28         # 784
TM_MAX = 1024             # batch-tile cap (~6.3 MiB double-buffered f32 output)
SPLIT_MIN = 512           # batch size above which we force >= 2 tiles (multi-core)


def decoder_kernel(x_ref, w1_ref, b1_ref, w2_ref, b2_ref, o_ref):
    # Layer 1: ReLU(x @ W1 + b1), f32 matmul with f32 accumulation.
    h = jnp.dot(x_ref[...], w1_ref[...], preferred_element_type=jnp.float32)
    h = jnp.maximum(h + b1_ref[...], 0.0)
    # Layer 2: ReLU(h @ W2 + b2).
    y = jnp.dot(h, w2_ref[...], preferred_element_type=jnp.float32)
    o_ref[...] = jnp.maximum(y + b2_ref[...], 0.0).astype(o_ref.dtype)


def _cdiv(a, m):
    return -(-a // m)


def _round_up(x, m):
    return ((x + m - 1) // m) * m


def _choose_tiling(b):
    """Return (tm, b_pad, n_tiles) for the batch axis."""
    if b <= TM_MAX:
        if b >= SPLIT_MIN and b % 16 == 0:
            # Two tiles so multi-core parts (v7x) shard the batch; tm = b/2 is a
            # multiple of 8 so no padding / tail slice is needed.
            return b // 2, b, 2
        # Single tile: block_shape equals the full array dims, so the (8,128)
        # constraint is satisfied without padding and no tail slice is needed.
        return b, b, 1
    n_tiles = _cdiv(b, TM_MAX)
    if b % n_tiles == 0 and (b // n_tiles) % 8 == 0:
        return b // n_tiles, b, n_tiles            # exact split, no padding
    tm = _round_up(_cdiv(b, n_tiles), 8)
    return tm, tm * n_tiles, n_tiles               # small pad, slice at the end


def prepare_params(w1, b1, w2, b2):
    """Pad hidden 100 -> 128 with zeros (inert: zero weight, zero bias, ReLU(0)=0)."""
    n_latent = w1.shape[0]
    w1p = jnp.zeros((n_latent, HIDDEN_PAD), jnp.float32).at[:, :HIDDEN].set(w1)
    b1p = jnp.zeros((1, HIDDEN_PAD), jnp.float32).at[:, :HIDDEN].set(b1)
    w2p = jnp.zeros((HIDDEN_PAD, OUT_DIM), jnp.float32).at[:HIDDEN, :].set(w2)
    return w1p, b1p, w2p, b2.astype(jnp.float32)


def decoder_forward(x, w1p, b1p, w2p, b2p):
    """x: (B, n_latent) f32 -> (B, 1, 28, 28) f32. Params from prepare_params()."""
    B, n_latent = x.shape
    tm, b_pad, n_tiles = _choose_tiling(max(B, 1))

    xin = x
    if b_pad != B:
        xin = jnp.pad(x, ((0, b_pad - B), (0, 0)))

    weight_bytes = 4 * (w1p.size + b1p.size + w2p.size + b2p.size)
    cost = pl.CostEstimate(
        flops=2 * b_pad * (n_latent * HIDDEN_PAD + HIDDEN_PAD * OUT_DIM),
        transcendentals=0,
        bytes_accessed=4 * b_pad * (n_latent + OUT_DIM) + weight_bytes,
    )

    out = pl.pallas_call(
        decoder_kernel,
        out_shape=jax.ShapeDtypeStruct((b_pad, OUT_DIM), jnp.float32),
        grid=(n_tiles,),
        in_specs=[
            # x: one batch tile per grid step (double-buffered by Pallas).
            pl.BlockSpec((tm, n_latent), lambda i: (i, 0)),
            # Weights / biases: constant block index -> stay resident in VMEM.
            pl.BlockSpec(w1p.shape, lambda i: (0, 0)),
            pl.BlockSpec(b1p.shape, lambda i: (0, 0)),
            pl.BlockSpec(w2p.shape, lambda i: (0, 0)),
            pl.BlockSpec(b2p.shape, lambda i: (0, 0)),
        ],
        out_specs=pl.BlockSpec((tm, OUT_DIM), lambda i: (i, 0)),
        compiler_params=pltpu.CompilerParams(
            # Batch tiles are independent -> shard across TCs on multi-core chips.
            dimension_semantics=("parallel",),
        ),
        cost_estimate=cost,
    )(xin, w1p, b1p, w2p, b2p)

    if b_pad != B:
        # Only reachable when B > TM_MAX and B does not split evenly; for all
        # other batch sizes the padded-output slice (an extra HBM pass) is gone.
        out = out[:B]
    # .view(-1, 1, 28, 28) equivalent (pure metadata, done in JAX).
    return out.reshape(-1, 1, 28, 28)


def init_params(key, n_latent_units, hidden=HIDDEN, out=OUT_DIM):
    """PyTorch nn.Linear-style init (U[-1/sqrt(fan_in), 1/sqrt(fan_in)]), f32, unpadded."""
    k1, k2, k3, k4 = jax.random.split(key, 4)
    bound1 = 1.0 / jnp.sqrt(n_latent_units)
    bound2 = 1.0 / jnp.sqrt(hidden)
    w1 = jax.random.uniform(k1, (n_latent_units, hidden), jnp.float32, -bound1, bound1)
    b1 = jax.random.uniform(k2, (1, hidden), jnp.float32, -bound1, bound1)
    w2 = jax.random.uniform(k3, (hidden, out), jnp.float32, -bound2, bound2)
    b2 = jax.random.uniform(k4, (1, out), jnp.float32, -bound2, bound2)
    return w1, b1, w2, b2


if __name__ == "__main__":
    key = jax.random.PRNGKey(0)
    batch = 2
    n_latent_units = 32

    kx, kp = jax.random.split(key)
    x = jax.random.normal(kx, (batch, n_latent_units), dtype=jnp.float32)
    w1, b1, w2, b2 = init_params(kp, n_latent_units)
    w1p, b1p, w2p, b2p = prepare_params(w1, b1, w2, b2)

    out = decoder_forward(x, w1p, b1p, w2p, b2p)
    out = jax.block_until_ready(out)

    # Pure-JAX f32 reference (unpadded weights).
    ref = jnp.maximum(x @ w1 + b1, 0.0)
    ref = jnp.maximum(ref @ w2 + b2, 0.0).reshape(-1, 1, 28, 28)
    assert out.shape == (batch, 1, 28, 28), out.shape
    assert jnp.allclose(out, ref, atol=1e-2, rtol=1e-2), "mismatch vs reference"

    print("KERNEL_OK")
</pallas_src>

<mosaic_0001>
module attributes {stable_mosaic.version = 11 : i64} {
  func.func @decoder_kernel(%arg0: i32, %arg1: memref<2x32xf32, #tpu.memory_space<vmem>>, %arg2: memref<32x128xf32, #tpu.memory_space<vmem>>, %arg3: memref<1x128xf32, #tpu.memory_space<vmem>>, %arg4: memref<128x784xf32, #tpu.memory_space<vmem>>, %arg5: memref<1x784xf32, #tpu.memory_space<vmem>>, %arg6: memref<2x784xf32, #tpu.memory_space<vmem>>) attributes {dimension_semantics = [#tpu.dimension_semantics<parallel>], iteration_bounds = array<i64: 1>, scalar_prefetch = 0 : i64, scratch_operands = 0 : i64, tpu.core_type = #tpu.core_type<tc>, window_params = [{transform_indices = @transform_0, window_bounds = array<i64: 2, 32>}, {pipeline_mode = #tpu.pipeline_mode<synchronous>, transform_indices = @transform_1, window_bounds = array<i64: 32, 128>}, {pipeline_mode = #tpu.pipeline_mode<synchronous>, transform_indices = @transform_2, window_bounds = array<i64: 1, 128>}, {pipeline_mode = #tpu.pipeline_mode<synchronous>, transform_indices = @transform_3, window_bounds = array<i64: 128, 784>}, {pipeline_mode = #tpu.pipeline_mode<synchronous>, transform_indices = @transform_4, window_bounds = array<i64: 1, 784>}, {transform_indices = @transform_5, window_bounds = array<i64: 2, 784>}]} {
    %c0 = arith.constant 0 : index
    %c0_0 = arith.constant 0 : index
    %0 = vector.load %arg1[%c0, %c0_0] : memref<2x32xf32, #tpu.memory_space<vmem>>, vector<2x32xf32>
    %c0_1 = arith.constant 0 : index
    %c0_2 = arith.constant 0 : index
    %1 = vector.load %arg2[%c0_1, %c0_2] : memref<32x128xf32, #tpu.memory_space<vmem>>, vector<32x128xf32>
    %cst = arith.constant dense<0.000000e+00> : vector<2x128xf32>
    %2 = tpu.matmul %0, %1, %cst {dimension_numbers = #tpu.dot_dimension_numbers<[1], [0], [0], [1], [0, 0, 1, 1], [], []>} : vector<2x32xf32>, vector<32x128xf32>, vector<2x128xf32> -> vector<2x128xf32>
    %c0_3 = arith.constant 0 : index
    %c0_4 = arith.constant 0 : index
    %3 = vector.load %arg3[%c0_3, %c0_4] : memref<1x128xf32, #tpu.memory_space<vmem>>, vector<1x128xf32>
    %4 = vector.broadcast %3 : vector<1x128xf32> to vector<2x128xf32>
    %5 = arith.addf %2, %4 : vector<2x128xf32>
    %cst_5 = arith.constant 0.000000e+00 : f32
    %6 = vector.broadcast %cst_5 : f32 to vector<2x128xf32>
    %7 = arith.maximumf %5, %6 : vector<2x128xf32>
    %c0_6 = arith.constant 0 : index
    %c0_7 = arith.constant 0 : index
    %8 = vector.load %arg4[%c0_6, %c0_7] : memref<128x784xf32, #tpu.memory_space<vmem>>, vector<128x784xf32>
    %cst_8 = arith.constant dense<0.000000e+00> : vector<2x784xf32>
    %9 = tpu.matmul %7, %8, %cst_8 {dimension_numbers = #tpu.dot_dimension_numbers<[1], [0], [0], [1], [0, 0, 1, 1], [], []>} : vector<2x128xf32>, vector<128x784xf32>, vector<2x784xf32> -> vector<2x784xf32>
    %c0_9 = arith.constant 0 : index
    %c0_10 = arith.constant 0 : index
    %10 = vector.load %arg5[%c0_9, %c0_10] : memref<1x784xf32, #tpu.memory_space<vmem>>, vector<1x784xf32>
    %11 = vector.broadcast %10 : vector<1x784xf32> to vector<2x784xf32>
    %12 = arith.addf %9, %11 : vector<2x784xf32>
    %cst_11 = arith.constant 0.000000e+00 : f32
    %13 = vector.broadcast %cst_11 : f32 to vector<2x784xf32>
    %14 = arith.maximumf %12, %13 : vector<2x784xf32>
    %c0_12 = arith.constant 0 : index
    %c0_13 = arith.constant 0 : index
    %15 = vector.load %arg6[%c0_12, %c0_13] : memref<2x784xf32, #tpu.memory_space<vmem>>, vector<2x784xf32>
    tpu.vector_store %arg6[%c0_12, %c0_13], %14 {strides = array<i32>} : memref<2x784xf32, #tpu.memory_space<vmem>>, vector<2x784xf32>,
    return
  }
  func.func @transform_0(%arg0: i32) -> (i32, i32) {
    %c0_i32 = arith.constant 0 : i32
    %c0_i32_0 = arith.constant 0 : i32
    return %arg0, %c0_i32 : i32, i32
  }
  func.func @transform_1(%arg0: i32) -> (i32, i32) {
    %c0_i32 = arith.constant 0 : i32
    %c0_i32_0 = arith.constant 0 : i32
    %c0_i32_1 = arith.constant 0 : i32
    return %c0_i32, %c0_i32_0 : i32, i32
  }
  func.func @transform_2(%arg0: i32) -> (i32, i32) {
    %c0_i32 = arith.constant 0 : i32
    %c0_i32_0 = arith.constant 0 : i32
    %c0_i32_1 = arith.constant 0 : i32
    return %c0_i32, %c0_i32_0 : i32, i32
  }
  func.func @transform_3(%arg0: i32) -> (i32, i32) {
    %c0_i32 = arith.constant 0 : i32
    %c0_i32_0 = arith.constant 0 : i32
    %c0_i32_1 = arith.constant 0 : i32
    return %c0_i32, %c0_i32_0 : i32, i32
  }
  func.func @transform_4(%arg0: i32) -> (i32, i32) {
    %c0_i32 = arith.constant 0 : i32
    %c0_i32_0 = arith.constant 0 : i32
    %c0_i32_1 = arith.constant 0 : i32
    return %c0_i32, %c0_i32_0 : i32, i32
  }
  func.func @transform_5(%arg0: i32) -> (i32, i32) {
    %c0_i32 = arith.constant 0 : i32
    %c0_i32_0 = arith.constant 0 : i32
    return %arg0, %c0_i32 : i32, i32
  }
}

</mosaic_0001>

<bundles_post_ra>
// kernel: tpu_custom_call.1
= control target key start
LH: loop header
LB: loop body
LE: loop exit
PB: predicated region body
PF: predicated region fallthrough
CT: control target
= control target key end

     0   :  { %v706_v1 = vmov 0.0   ;;  %vm707_vm0 = vmmov 0   ;;  %vm33_vm1 = vcmask 261120   ;;  %s1133_s0 = inlined_call_operand.vmem [shape: f32[2,32], index: 0, kind: input, shape index: {}]   ;;  %s1134_s1 = inlined_call_operand.vmem [shape: f32[32,128], index: 1, kind: input, shape index: {}]   ;;  %s1135_s2 = inlined_call_operand.vmem [shape: f32[1,128], index: 2, kind: input, shape index: {}]   ;;  %s1136_s3 = inlined_call_operand.vmem [shape: f32[128,784], index: 3, kind: input, shape index: {}]   ;;  %s1137_s4 = inlined_call_operand.vmem [shape: f32[1,784], index: 4, kind: input, shape index: {}]   ;;  %s1138_s5 = inlined_call_operand.hbm [shape: f32[2,784], index: 5, kind: output, shape index: {}]  }
   0x1   :  { %v25_v0 = vld [vmem:[%s1134_s1 + $0x18] sm:$0xff]  ;;  %634 = vmatprep.subr.mxu0 %v706_v1  ;;  %v24_v2 = vld [vmem:[%s1134_s1 + $0x10] sm:$0xff]  ;;  %642 = vmatprep.mubr.msk.f32.mxu0 %vm707_vm0, %v706_v1  ;;  %v213_v4 = vld [vmem:[%s1136_s3 + $0x348] sm:$0xff] }
   0x2   :  { %v214_v3 = vld [vmem:[%s1136_s3 + $0x350] sm:$0xff]  ;;  %635 = vmatpush3.msra.mxu0 %v25_v0  ;;  %v23_v5 = vld [vmem:[%s1134_s1 + $0x8] sm:$0xff]  ;;  %v207_v6 = vld [vmem:[%s1136_s3 + $0x318] sm:$0xff] }
   0x3   :  { %257 = vmatprep.subr.mxu1 %v214_v3  ;;  %636 = vmatprep.subr.mxu0 %v706_v1  ;;  %v206_v7 = vld [vmem:[%s1136_s3 + $0x310] sm:$0xff]  ;;  %v200_v8 = vld [vmem:[%s1136_s3 + $0x2e0] sm:$0xff]  ;;  %v199_v10 = vld [vmem:[%s1136_s3 + $0x2d8] sm:$0xff] }
   0x4   :  { %258 = vmatpush1.msra.mxu1 %v213_v4  ;;  %637 = vmatpush3.msra.mxu0 %v24_v2  ;;  %v22_v9 = vld [vmem:[%s1134_s1] sm:$0xff]  ;;  %v193_v11 = vld [vmem:[%s1136_s3 + $0x2a8] sm:$0xff]  ;;  %v215_v14 = vld [vmem:[%s1136_s3 + $0x358] sm:$0xff] }
   0x5   :  { %259 = vmatprep.subr.mxu1 %v207_v6  ;;  %638 = vmatprep.subr.mxu0 %v706_v1  ;;  %v21_v12 = vld [vmem:[%s1133_s0] sm:$0x3]  ;;  %v209_v16 = vld [vmem:[%s1136_s3 + $0x328] sm:$0xff]  ;;  %v186_v17 = vld [vmem:[%s1136_s3 + $0x270] sm:$0xff] }
   0x6   :  { %260 = vmatpush1.msra.mxu1 %v206_v7  ;;  %639 = vmatpush3.msra.mxu0 %v23_v5  ;;  %v216_v13 = vld [vmem:[%s1136_s3 + $0x360] sm:$0xff]  ;;  %v185_v19 = vld [vmem:[%s1136_s3 + $0x268] sm:$0xff]  ;;  %v202_v20 = vld [vmem:[%s1136_s3 + $0x2f0] sm:$0xff] }
   0x7   :  { %261 = vmatprep.subr.mxu1 %v200_v8  ;;  %640 = vmatprep.subr.mxu0 %v706_v1  ;;  %v192_v15 = vld [vmem:[%s1136_s3 + $0x2a0] sm:$0xff]  ;;  %v179_v21 = vld [vmem:[%s1136_s3 + $0x238] sm:$0xff]  ;;  %v201_v22 = vld [vmem:[%s1136_s3 + $0x2e8] sm:$0xff] }
   0x8   :  { %262 = vmatpush1.msra.mxu1 %v199_v10  ;;  %641 = vmatpush3.msra.mxu0 %v22_v9  ;;  %v208_v18 = vld [vmem:[%s1136_s3 + $0x320] sm:$0xff]  ;;  %v178_v23 = vld [vmem:[%s1136_s3 + $0x230] sm:$0xff]  ;;  %v195_v24 = vld [vmem:[%s1136_s3 + $0x2b8] sm:$0xff] }
   0x9   :  { %263 = vmatprep.subr.mxu1 %v193_v11  ;;  %643 = vmatmul.mubr.msk.f32.vlgmr.msra.gmra.mxu0 %vm33_vm1, %v21_v12  ;;  %v172_v25 = vld [vmem:[%s1136_s3 + $0x200] sm:$0xff]  ;;  %v194_v26 = vld [vmem:[%s1136_s3 + $0x2b0] sm:$0xff]  ;;  %v171_v27 = vld [vmem:[%s1136_s3 + $0x1f8] sm:$0xff] }
   0xa   :  { %328 = vmatprep.subr.mxu0 %v216_v13  ;;  %264 = vmatpush1.msra.mxu1 %v192_v15  ;;  %v188_v28 = vld [vmem:[%s1136_s3 + $0x280] sm:$0xff]  ;;  %v165_v29 = vld [vmem:[%s1136_s3 + $0x1c8] sm:$0xff]  ;;  %v187_v30 = vld [vmem:[%s1136_s3 + $0x278] sm:$0xff] }
   0xb   :  { %329 = vmatpush1.msra.mxu0 %v215_v14  ;;  %265 = vmatprep.subr.mxu1 %v186_v17  ;;  %v164_v31 = vld [vmem:[%s1136_s3 + $0x1c0] sm:$0xff]  ;;  %v181_v32 = vld [vmem:[%s1136_s3 + $0x248] sm:$0xff]  ;;  %v158_v33 = vld [vmem:[%s1136_s3 + $0x190] sm:$0xff] }
   0xc   :  { %330 = vmatprep.subr.mxu0 %v209_v16  ;;  %266 = vmatpush1.msra.mxu1 %v185_v19  ;;  %v180_v34 = vld [vmem:[%s1136_s3 + $0x240] sm:$0xff]  ;;  %v157_v35 = vld [vmem:[%s1136_s3 + $0x188] sm:$0xff]  ;;  %v174_v36 = vld [vmem:[%s1136_s3 + $0x210] sm:$0xff] }
   0xd   :  { %331 = vmatpush1.msra.mxu0 %v208_v18  ;;  %267 = vmatprep.subr.mxu1 %v179_v21  ;;  %v151_v37 = vld [vmem:[%s1136_s3 + $0x158] sm:$0xff]  ;;  %v173_v38 = vld [vmem:[%s1136_s3 + $0x208] sm:$0xff]  ;;  %v150_v39 = vld [vmem:[%s1136_s3 + $0x150] sm:$0xff] }
   0xe   :  { %332 = vmatprep.subr.mxu0 %v202_v20  ;;  %268 = vmatpush1.msra.mxu1 %v178_v23  ;;  %v167_v40 = vld [vmem:[%s1136_s3 + $0x1d8] sm:$0xff]  ;;  %v144_v41 = vld [vmem:[%s1136_s3 + $0x120] sm:$0xff] }
   0xf   :  { %333 = vmatpush1.msra.mxu0 %v201_v22  ;;  %269 = vmatprep.subr.mxu1 %v172_v25 }
  0x10   :  { %334 = vmatprep.subr.mxu0 %v195_v24  ;;  %270 = vmatpush1.msra.mxu1 %v171_v27 }
  0x11   :  { %335 = vmatpush1.msra.mxu0 %v194_v26  ;;  %271 = vmatprep.subr.mxu1 %v165_v29 }
  0x12   :  { %336 = vmatprep.subr.mxu0 %v188_v28  ;;  %272 = vmatpush1.msra.mxu1 %v164_v31 }
  0x13   :  { %337 = vmatpush1.msra.mxu0 %v187_v30  ;;  %273 = vmatprep.subr.mxu1 %v158_v33 }
  0x14   :  { %338 = vmatprep.subr.mxu0 %v181_v32  ;;  %274 = vmatpush1.msra.mxu1 %v157_v35 }
  0x15   :  { %339 = vmatpush1.msra.mxu0 %v180_v34 }
  0x16   :  { %10 = vsyncpa [#allocation3], 0  ;;  %340 = vmatprep.subr.mxu0 %v174_v36  ;;  %v166_v42 = vld [vmem:[%s1136_s3 + $0x1d0] sm:$0xff]  ;;  %275 = vmatprep.subr.mxu1 %v151_v37  ;;  %v143_v43 = vld [vmem:[%s1136_s3 + $0x118] sm:$0xff]  ;;  %vm590_vm2 = vcmask 1041408   ;;  %vm591_vm3 = vcmask 1043458  }
  0x17   :  { %341 = vmatpush1.msra.mxu0 %v173_v38  ;;  %v160_v44 = vld [vmem:[%s1136_s3 + $0x1a0] sm:$0xff]  ;;  %276 = vmatpush1.msra.mxu1 %v150_v39  ;;  %v137_v45 = vld [vmem:[%s1136_s3 + $0xe8] sm:$0xff]  ;;  %v159_v46 = vld [vmem:[%s1136_s3 + $0x198] sm:$0xff]  ;;  %vm593_vm5 = vcmask 128004  }
  0x18   :  { %342 = vmatprep.subr.mxu0 %v167_v40  ;;  %277 = vmatprep.subr.mxu1 %v144_v41  ;;  %v136_v47 = vld [vmem:[%s1136_s3 + $0xe0] sm:$0xff]  ;;  %v153_v48 = vld [vmem:[%s1136_s3 + $0x168] sm:$0xff]  ;;  %v130_v49 = vld [vmem:[%s1136_s3 + $0xb0] sm:$0xff] }
  0x19   :  { %343 = vmatpush1.msra.mxu0 %v166_v42  ;;  %278 = vmatpush1.msra.mxu1 %v143_v43  ;;  %v152_v50 = vld [vmem:[%s1136_s3 + $0x160] sm:$0xff]  ;;  %v129_v51 = vld [vmem:[%s1136_s3 + $0xa8] sm:$0xff]  ;;  %v146_v52 = vld [vmem:[%s1136_s3 + $0x130] sm:$0xff] }
  0x1a   :  { %344 = vmatprep.subr.mxu0 %v160_v44  ;;  %279 = vmatprep.subr.mxu1 %v137_v45  ;;  %v123_v53 = vld [vmem:[%s1136_s3 + $0x78] sm:$0xff]  ;;  %v145_v54 = vld [vmem:[%s1136_s3 + $0x128] sm:$0xff]  ;;  %v122_v55 = vld [vmem:[%s1136_s3 + $0x70] sm:$0xff] }
  0x1b   :  { %345 = vmatpush1.msra.mxu0 %v159_v46  ;;  %280 = vmatpush1.msra.mxu1 %v136_v47  ;;  %v139_v56 = vld [vmem:[%s1136_s3 + $0xf8] sm:$0xff]  ;;  %v138_v57 = vld [vmem:[%s1136_s3 + $0xf0] sm:$0xff]  ;;  %v132_v58 = vld [vmem:[%s1136_s3 + $0xc0] sm:$0xff] }
  0x1c   :  { %346 = vmatprep.subr.mxu0 %v153_v48  ;;  %281 = vmatprep.subr.mxu1 %v130_v49  ;;  %v131_v59 = vld [vmem:[%s1136_s3 + $0xb8] sm:$0xff]  ;;  %v125_v60 = vld [vmem:[%s1136_s3 + $0x88] sm:$0xff]  ;;  %v124_v61 = vld [vmem:[%s1136_s3 + $0x80] sm:$0xff] }
  0x1d   :  { %347 = vmatpush1.msra.mxu0 %v152_v50  ;;  %282 = vmatpush1.msra.mxu1 %v129_v51  ;;  %v116_v62 = vld [vmem:[%s1136_s3 + $0x40] sm:$0xff]  ;;  %v118_v63 = vld [vmem:[%s1136_s3 + $0x50] sm:$0xff]  ;;  %v115_v0 = vld [vmem:[%s1136_s3 + $0x38] sm:$0xff] }
  0x1e   :  { %348 = vmatprep.subr.mxu0 %v146_v52  ;;  %283 = vmatprep.subr.mxu1 %v123_v53  ;;  %v117_v2 = vld [vmem:[%s1136_s3 + $0x48] sm:$0xff]  ;;  %v111_v4 = vld [vmem:[%s1136_s3 + $0x18] sm:$0xff]  ;;  %v108_v5 = vld [vmem:[%s1136_s3] sm:$0xff] }
  0x1f   :  { %349 = vmatpush1.msra.mxu0 %v145_v54  ;;  %284 = vmatpush1.msra.mxu1 %v122_v55  ;;  %v109_v3 = vld [vmem:[%s1136_s3 + $0x8] sm:$0xff]  ;;  %v110_v6 = vld [vmem:[%s1136_s3 + $0x10] sm:$0xff]  ;;  %v610_v8 = vld [vmem:[%s1135_s2] ss:$0 sm:$0xff] }
  0x20   :  { %350 = vmatprep.subr.mxu0 %v139_v56  ;;  %321 = vmatprep.mubr.f32.mxu1 %v706_v1  ;;  %v218_v7 = vld [vmem:[%s1136_s3 + $0x370] sm:$0xff]  ;;  %v217_v13 = vld [vmem:[%s1136_s3 + $0x368] sm:$0xff]  ;;  %v219_v14 = vld [vmem:[%s1136_s3 + $0x378] sm:$0xff] }
  0x21   :  { %351 = vmatpush1.msra.mxu0 %v138_v57  ;;  %392 = vmatprep.mubr.f32.mxu0 %v706_v1  ;;  %v211_v15 = vld [vmem:[%s1136_s3 + $0x338] sm:$0xff]  ;;  %v210_v16 = vld [vmem:[%s1136_s3 + $0x330] sm:$0xff]  ;;  %v212_v17 = vld [vmem:[%s1136_s3 + $0x340] sm:$0xff] }
  0x22   :  { %352 = vmatprep.subr.mxu0 %v132_v58  ;;  %285 = vmatprep.subr.mxu1 %v116_v62  ;;  %v204_v18 = vld [vmem:[%s1136_s3 + $0x300] sm:$0xff]  ;;  %v203_v19 = vld [vmem:[%s1136_s3 + $0x2f8] sm:$0xff]  ;;  %v205_v20 = vld [vmem:[%s1136_s3 + $0x308] sm:$0xff] }
  0x23   :  { %353 = vmatpush1.msra.mxu0 %v131_v59  ;;  %286 = vmatpush1.msra.mxu1 %v115_v0  ;;  %v197_v21 = vld [vmem:[%s1136_s3 + $0x2c8] sm:$0xff]  ;;  %v196_v22 = vld [vmem:[%s1136_s3 + $0x2c0] sm:$0xff]  ;;  %v198_v23 = vld [vmem:[%s1136_s3 + $0x2d0] sm:$0xff] }
  0x24   :  { %354 = vmatprep.subr.mxu0 %v125_v60  ;;  %287 = vmatprep.subr.mxu1 %v109_v3  ;;  %v190_v24 = vld [vmem:[%s1136_s3 + $0x290] sm:$0xff]  ;;  %v189_v25 = vld [vmem:[%s1136_s3 + $0x288] sm:$0xff]  ;;  %v191_v26 = vld [vmem:[%s1136_s3 + $0x298] sm:$0xff]  ;;  %v222_v60 = vlaneseq }
  0x25   :  { %355 = vmatpush1.msra.mxu0 %v124_v61  ;;  %288 = vmatpush1.msra.mxu1 %v108_v5  ;;  %v183_v27 = vld [vmem:[%s1136_s3 + $0x258] sm:$0xff]  ;;  %v182_v28 = vld [vmem:[%s1136_s3 + $0x250] sm:$0xff]  ;;  %v184_v29 = vld [vmem:[%s1136_s3 + $0x260] sm:$0xff] }
  0x26   :  { %356 = vmatprep.subr.mxu0 %v118_v63  ;;  %399 = vmatprep.subr.mxu1 %v218_v7  ;;  %v176_v30 = vld [vmem:[%s1136_s3 + $0x220] sm:$0xff]  ;;  %v175_v31 = vld [vmem:[%s1136_s3 + $0x218] sm:$0xff]  ;;  %v177_v32 = vld [vmem:[%s1136_s3 + $0x228] sm:$0xff]  ;;  %v223_v61 = vshrl.u32 %v222_v60, 7 }
  0x27   :  { %357 = vmatpush1.msra.mxu0 %v117_v2  ;;  %v169_v33 = vld [vmem:[%s1136_s3 + $0x1e8] sm:$0xff]  ;;  %v168_v34 = vld [vmem:[%s1136_s3 + $0x1e0] sm:$0xff]  ;;  %v170_v35 = vld [vmem:[%s1136_s3 + $0x1f0] sm:$0xff] }
  0x28   :  { %358 = vmatprep.subr.mxu0 %v111_v4  ;;  %v162_v36 = vld [vmem:[%s1136_s3 + $0x1b0] sm:$0xff]  ;;  %v161_v37 = vld [vmem:[%s1136_s3 + $0x1a8] sm:$0xff]  ;;  %v163_v38 = vld [vmem:[%s1136_s3 + $0x1b8] sm:$0xff]  ;;  %v224_v62 = vsub.s32 0, %v223_v61  ;;  %v232_v63 = vsub.s32 2, %v223_v61  ;;  %v228_v2 = vsub.s32 1, %v223_v61 }
  0x29   :  { %359 = vmatpush1.msra.mxu0 %v110_v6  ;;  %v155_v39 = vld [vmem:[%s1136_s3 + $0x178] sm:$0xff]  ;;  %v154_v40 = vld [vmem:[%s1136_s3 + $0x170] sm:$0xff]  ;;  %v156_v41 = vld [vmem:[%s1136_s3 + $0x180] sm:$0xff]  ;;  %v236_v3 = vsub.s32 3, %v223_v61  ;;  %v708_v4 = vmov 1983009808  }
  0x2a   :  { %645 = vmatprep.subr.mxu0 %v706_v1  ;;  %v148_v42 = vld [vmem:[%s1136_s3 + $0x140] sm:$0xff]  ;;  %v147_v43 = vld [vmem:[%s1136_s3 + $0x138] sm:$0xff]  ;;  %v149_v44 = vld [vmem:[%s1136_s3 + $0x148] sm:$0xff]  ;;  %v557_v5 = vunpack.c.l.s4 %v708_v4 }
  0x2b   :  { %v141_v45 = vld [vmem:[%s1136_s3 + $0x108] sm:$0xff]  ;;  %v140_v46 = vld [vmem:[%s1136_s3 + $0x100] sm:$0xff]  ;;  %v142_v47 = vld [vmem:[%s1136_s3 + $0x110] sm:$0xff] }
  0x2c   :  { %v134_v48 = vld [vmem:[%s1136_s3 + $0xd0] sm:$0xff]  ;;  %v133_v49 = vld [vmem:[%s1136_s3 + $0xc8] sm:$0xff]  ;;  %v135_v50 = vld [vmem:[%s1136_s3 + $0xd8] sm:$0xff] }
  0x2d   :  { %v127_v51 = vld [vmem:[%s1136_s3 + $0x98] sm:$0xff]  ;;  %v126_v52 = vld [vmem:[%s1136_s3 + $0x90] sm:$0xff]  ;;  %v128_v53 = vld [vmem:[%s1136_s3 + $0xa0] sm:$0xff] }
  0x2e   :  { %v120_v54 = vld [vmem:[%s1136_s3 + $0x60] sm:$0xff]  ;;  %v119_v55 = vld [vmem:[%s1136_s3 + $0x58] sm:$0xff]  ;;  %v121_v56 = vld [vmem:[%s1136_s3 + $0x68] sm:$0xff] }
  0x2f   :  { %v113_v57 = vld [vmem:[%s1136_s3 + $0x28] sm:$0xff]  ;;  %v112_v58 = vld [vmem:[%s1136_s3 + $0x20] sm:$0xff]  ;;  %v114_v59 = vld [vmem:[%s1136_s3 + $0x30] sm:$0xff] }
  0x30   :  { %v220_v0 = vld [vmem:[%s1137_s4] sm:$0x7f]  ;;  %vm592_vm4 = vmor %vm591_vm3, %vm590_vm2  ;;  %s709_s4 = smov [#allocation2]  }
  0x31   :  { %v225_v6 = vrot.slane %v220_v0, %v224_v62  ;;  %v233_v7 = vrot.slane %v220_v0, %v232_v63  ;;  %s602_s10 = sshll.u32 %s709_s4, 4  ;;  %vm594_vm6 = vmor %vm593_vm5, %vm592_vm4  ;;  %s603_s10 = int_to_ptr.vmem [resolvable:$true] %s602_s10 }
  0x32   :  { %s684_s11 = scalar_lea.vmem %s603_s10, 224  ;;  %p689_p1 = scmp.lt.s32.totalorder %s603_s10, %s603_s10 }
  0x33   :  { %p685_p0 = scmp.ne.s32.totalorder %s603_s10, %s684_s11  ;;  %p690_p2 = scmp.lt.s32.totalorder %s684_s11, %s684_s11 }
  0x35   :  { %p691_p3 = por %p690_p2, %p689_p1 }
  0x37   :  { %p692_p4 = pnand %p691_p3, %p685_p0 }
  0xc9   :  { %v103_v9 = vpop.f32.mrf.mxu0 }
  0xca   :  { %v104_v10 = vadd.f32 %v610_v8, %v103_v9  ;;  %v229_v8 = vrot.slane %v220_v0, %v228_v2 }
  0xcb   :  { %v644_v11 = vpop.f32.mrf.mxu0 }
  0xcc   :  { %v962_v12 = vmax.f32 %v104_v10, 0.0  ;;  %v558_v11 = vunpack.c.0.s8 %v557_v5 }
  0xce   :  { %322 = vmatmul.mubr.f32.vlgmr.msra.gmra.mxu1 %v962_v12  ;;  %393 = vmatmul.mubr.f32.vlgmr.msra.gmra.mxu0 %v962_v12 }
  0xcf   :  { %400 = vmatpush1.msra.mxu1 %v217_v13  ;;  %646 = vmatpush3.msra.mxu0 %v219_v14 }
  0xd0   :  { %401 = vmatprep.subr.mxu1 %v211_v15  ;;  %647 = vmatprep.subr.mxu0 %v706_v1 }
  0xd1   :  { %402 = vmatpush1.msra.mxu1 %v210_v16  ;;  %648 = vmatpush3.msra.mxu0 %v212_v17 }
  0xd2   :  { %403 = vmatprep.subr.mxu1 %v204_v18  ;;  %649 = vmatprep.subr.mxu0 %v706_v1  ;;  %v561_v18 = vsub.s32 %v558_v11, %v223_v61 }
  0xd3   :  { %404 = vmatpush1.msra.mxu1 %v203_v19  ;;  %650 = vmatpush3.msra.mxu0 %v205_v20 }
  0xd4   :  { %405 = vmatprep.subr.mxu1 %v197_v21  ;;  %651 = vmatprep.subr.mxu0 %v706_v1 }
  0xd5   :  { %406 = vmatpush1.msra.mxu1 %v196_v22  ;;  %652 = vmatpush3.msra.mxu0 %v198_v23 }
  0xd6   :  { %407 = vmatprep.subr.mxu1 %v190_v24  ;;  %653 = vmatprep.subr.mxu0 %v706_v1 }
  0xd7   :  { %408 = vmatpush1.msra.mxu1 %v189_v25  ;;  %654 = vmatpush3.msra.mxu0 %v191_v26 }
  0xd8   :  { %409 = vmatprep.subr.mxu1 %v183_v27  ;;  %655 = vmatprep.subr.mxu0 %v706_v1 }
  0xd9   :  { %410 = vmatpush1.msra.mxu1 %v182_v28  ;;  %656 = vmatpush3.msra.mxu0 %v184_v29  ;;  %v240_v28 = vsub.s32 4, %v223_v61  ;;  %v248_v29 = vsub.s32 6, %v223_v61 }
  0xda   :  { %411 = vmatprep.subr.mxu1 %v176_v30  ;;  %657 = vmatprep.subr.mxu0 %v706_v1  ;;  %v244_v30 = vsub.s32 5, %v223_v61 }
  0xdb   :  { %412 = vmatpush1.msra.mxu1 %v175_v31  ;;  %658 = vmatpush3.msra.mxu0 %v177_v32  ;;  %v241_v31 = vrot.slane %v220_v0, %v240_v28  ;;  %v249_v32 = vrot.slane %v220_v0, %v248_v29 }
  0xdc   :  { %413 = vmatprep.subr.mxu1 %v169_v33  ;;  %659 = vmatprep.subr.mxu0 %v706_v1  ;;  %v245_v33 = vrot.slane %v220_v0, %v244_v30 }
  0xdd   :  { %414 = vmatpush1.msra.mxu1 %v168_v34  ;;  %660 = vmatpush3.msra.mxu0 %v170_v35 }
  0xde   :  { %415 = vmatprep.subr.mxu1 %v162_v36  ;;  %661 = vmatprep.subr.mxu0 %v706_v1 }
  0xdf   :  { %416 = vmatpush1.msra.mxu1 %v161_v37  ;;  %662 = vmatpush3.msra.mxu0 %v163_v38 }
  0xe0   :  { %417 = vmatprep.subr.mxu1 %v155_v39  ;;  %663 = vmatprep.subr.mxu0 %v706_v1 }
  0xe1   :  { %418 = vmatpush1.msra.mxu1 %v154_v40  ;;  %664 = vmatpush3.msra.mxu0 %v156_v41 }
  0xe2   :  { %419 = vmatprep.subr.mxu1 %v148_v42  ;;  %665 = vmatprep.subr.mxu0 %v706_v1 }
  0xe3   :  { %420 = vmatpush1.msra.mxu1 %v147_v43  ;;  %666 = vmatpush3.msra.mxu0 %v149_v44 }
  0xe4   :  { %421 = vmatprep.subr.mxu1 %v141_v45  ;;  %667 = vmatprep.subr.mxu0 %v706_v1 }
  0xe5   :  { %422 = vmatpush1.msra.mxu1 %v140_v46  ;;  %668 = vmatpush3.msra.mxu0 %v142_v47 }
  0xe6   :  { %423 = vmatprep.subr.mxu1 %v134_v48  ;;  %669 = vmatprep.subr.mxu0 %v706_v1 }
  0xe7   :  { %424 = vmatpush1.msra.mxu1 %v133_v49  ;;  %670 = vmatpush3.msra.mxu0 %v135_v50 }
  0xe8   :  { %425 = vmatprep.subr.mxu1 %v127_v51  ;;  %671 = vmatprep.subr.mxu0 %v706_v1 }
  0xe9   :  { %426 = vmatpush1.msra.mxu1 %v126_v52  ;;  %672 = vmatpush3.msra.mxu0 %v128_v53 }
  0xea   :  { %427 = vmatprep.subr.mxu1 %v120_v54  ;;  %673 = vmatprep.subr.mxu0 %v706_v1 }
  0xeb   :  { %428 = vmatpush1.msra.mxu1 %v119_v55  ;;  %674 = vmatpush3.msra.mxu0 %v121_v56 }
  0xec   :  { %429 = vmatprep.subr.mxu1 %v113_v57  ;;  %675 = vmatprep.subr.mxu0 %v706_v1 }
  0xed   :  { %430 = vmatpush1.msra.mxu1 %v112_v58  ;;  %463 = vmatprep.mubr.f32.mxu1 %v706_v1 }
  0xee   :  { %676 = vmatpush3.msra.mxu0 %v114_v59  ;;  %677 = vmatprep.mubr.msk.f32.mxu0 %vm707_vm0, %v706_v1  ;;  %v237_v1 = vrot.slane %v220_v0, %v236_v3 }
  0xef   :  { %464 = vmatmul.mubr.f32.vlgmr.msra.gmra.mxu1 %v962_v12  ;;  %678 = vmatmul.mubr.f32.vlgmr.msra.gmra.mxu0 %v962_v12 }
 0x18e   :  { %v323_v9 = vpop.f32.mrf.mxu1  ;;  %v394_v10 = vpop.f32.mrf.mxu0 }
 0x18f   :  { %v324_v12 = vadd.f32 %v323_v9, %v225_v6  ;;  %v395_v13 = vadd.f32 %v394_v10, %v233_v7 }
 0x190   :  { %v325_v14 = vpop.f32.mrf.mxu1  ;;  %v396_v15 = vpop.f32.mrf.mxu0 }
 0x191   :  { %v326_v16 = vadd.f32 %v325_v14, %v229_v8  ;;  %v397_v17 = vadd.f32 %v396_v15, %v237_v1  ;;  %v540_v19 = vmax.f32 %v324_v12, 0.0  ;;  %v542_v20 = vmax.f32 %v395_v13, 0.0 }
 0x193   :  { %v541_v21 = vmax.f32 %v326_v16, 0.0  ;;  %v543_v22 = vmax.f32 %v397_v17, 0.0 }
 0x195   :  { %v554_v23 = vcombine.low %v540_v19, %v541_v21  ;;  %v555_v24 = vcombine.low %v542_v20, %v543_v22 }
 0x197   :  { %v562_v25 = vrot.slane %v554_v23, %v561_v18  ;;  %v569_v26 = vrot.slane %v555_v24, %v561_v18 }
 0x199   :  { %v570_v27 = vcombine.low %v562_v25, %v569_v26 }
 0x19b   :  { %589 = vst [vmem:[#allocation2] sm:$0xff] %v570_v27 }
 0x1af   :  { %v465_v34 = vpop.f32.mrf.mxu1  ;;  %v536_v35 = vpop.f32.mrf.mxu0 }
 0x1b0   :  { %v466_v36 = vadd.f32 %v465_v34, %v241_v31  ;;  %v537_v37 = vadd.f32 %v536_v35, %v249_v32 }
 0x1b1   :  { %v467_v38 = vpop.f32.mrf.mxu1  ;;  %v679_v39 = vpop.f32.mrf.mxu0 }
 0x1b2   :  { %v468_v40 = vadd.f32 %v467_v38, %v245_v33  ;;  %v544_v41 = vmax.f32 %v466_v36, 0.0  ;;  %v546_v42 = vmax.f32 %v537_v37, 0.0 }
 0x1b4   :  { %v545_v43 = vmax.f32 %v468_v40, 0.0  ;;  %v585_v45 = vrot.slane %v546_v42, %v561_v18 }
 0x1b6   :  { %v571_v44 = vcombine.low %v544_v41, %v545_v43 }
 0x1b8   :  { %v578_v46 = vrot.slane %v571_v44, %v561_v18 }
 0x1ba   :  { %v586_v47 = vcombine.low %v578_v46, %v585_v45 }
 0x1bc   :  { %595 = vst.msk [vmem:[#allocation2 + $0x8] sm:$0x3f] %vm594_vm6, %v586_v47 }
 0x1bd   :  { %695 = shalt.err (!%p692_p4)
}
 0x1be   :  { %605 = dma.vmem_to_hbm [thread:$0]  %s603_s10, 224, %s1138_s5, [#allocation3]  }
 0x1bf   :  { %704 = dma.done.wait [#allocation3], 224  }
 0x1c0   :  { %705 = vsyncadd [#allocation3], 4294967072 }
 0x1c1   :  { %609 = vsyncpa [#allocation3], 1 }

</bundles_post_ra>
